<compile_context>
chip_gen: v7x
topology: tpu7x:2x2x1
jax: 0.10.0
libtpu: 0.0.40
codegen_flags: <defaults>
</compile_context>

<pallas_src>
import math
import functools

import jax
import jax.numpy as jnp
from jax.experimental import pallas as pl
from jax.experimental.pallas import tpu as pltpu

_SQRT_2_OVER_PI = math.sqrt(2.0 / math.pi)
_GELU_COEF = 0.044715
_LANES = 128
# Lane-blocked tile for the (rare) ragged path: 256 * 128 lanes.  With the
# (8,128)/(16,128) native tiling of a (1, LB) block this is ~1 MiB physical
# VMEM per block -> ~4 MiB live when double-buffered.
_RAGGED_LANE_BLOCK = 256 * _LANES


def _round_up(n, m):
    return ((n + m - 1) // m) * m


def _gelu_kernel(x_ref, o_ref):
    # f32 internal math on every generation: the kernel is HBM-bound, the
    # VPU/EUP have slack, and v5e has no bf16 VPU/EUP at all.
    x = x_ref[...].astype(jnp.float32)
    # 0.5 * x * (1 + tanh(sqrt(2/pi) * (x + 0.044715 * x^3)))
    inner = _SQRT_2_OVER_PI * (x + _GELU_COEF * x * x * x)
    o_ref[...] = (0.5 * x * (1.0 + jnp.tanh(inner))).astype(o_ref.dtype)


def _chip_flags():
    """Best-effort chip-generation detection (trace-time, Python only)."""
    try:
        kind = jax.devices()[0].device_kind.lower()
    except Exception:  # pragma: no cover - defensive
        kind = ""
    is_v7 = "v7" in kind          # 2 TensorCores / chip, ~3.2 TB/s HBM
    is_v5e = ("v5e" in kind) or ("v5 lite" in kind) or ("v5litepod" in kind)
    return is_v7, is_v5e


@functools.partial(jax.jit, static_argnames=("block_rows", "donate_to_output"))
def gelu_pallas(x, block_rows=None, donate_to_output: bool = False):
    """Elementwise tanh-GELU. Accepts any shape; hot path runs in Pallas."""
    orig_shape = x.shape
    orig_dtype = x.dtype
    if not jnp.issubdtype(orig_dtype, jnp.floating):
        raise TypeError(f"gelu_pallas expects a floating dtype, got {orig_dtype}")

    n = x.size
    if n == 0:
        return x

    itemsize = jnp.dtype(orig_dtype).itemsize
    # Sublane alignment for the block row dim (f32: 8, bf16/f16: 16, fp8: 32).
    row_align = 8 if itemsize >= 4 else (16 if itemsize == 2 else 32)

    is_v7, is_v5e = _chip_flags()

    # Block sizing by bytes, not rows, so bf16/fp8 blocks match f32 blocks on
    # the tile-size/bandwidth curve.  v7x gets 2 MiB blocks (8 MiB live with
    # in+out double-buffering, fine vs. 32 MiB scoped / 64 MiB physical VMEM);
    # v5e/v6e get 1 MiB blocks (4 MiB live, fine vs. 16/32 MiB scoped).
    target_block_bytes = (2 << 20) if is_v7 else (1 << 20)
    max_block_bytes = (1 << 20) if is_v5e else (2 << 20)
    target_block_bytes = min(target_block_bytes, max_block_bytes)
    if block_rows is None:
        block_rows_eff = target_block_bytes // (_LANES * itemsize)
    else:
        # Cap caller-supplied sizes so double-buffered in+out always fits the
        # per-generation scoped-VMEM default.
        block_rows_eff = min(int(block_rows), max_block_bytes // (_LANES * itemsize))
    block_rows_eff = max(row_align, block_rows_eff)

    cost = pl.CostEstimate(
        flops=8 * n,
        transcendentals=n,
        bytes_accessed=2 * n * itemsize,
    )
    compiler_params = pltpu.CompilerParams(dimension_semantics=("parallel",))
    io_alias = {0: 0} if donate_to_output else {}

    x_flat = jnp.ravel(x)
    lane_aligned = (n % _LANES) == 0

    if lane_aligned:
        # Hot path: lane-dense (rows, 128) slab, zero extra HBM copies.
        rows = n // _LANES
        x2d = x_flat.reshape(rows, _LANES)

        br = max(row_align,
                 min(_round_up(block_rows_eff, row_align),
                     _round_up(rows, row_align)))
        # Only force a >=2-step split on multi-TensorCore chips (v7x); on
        # single-TC v5e/v6e it would just add per-step overhead.
        if is_v7 and rows > row_align and pl.cdiv(rows, br) < 2:
            br = max(row_align, _round_up(pl.cdiv(rows, 2), row_align))

        grid = (pl.cdiv(rows, br),)  # partial last block masked by Pallas
        out2d = pl.pallas_call(
            _gelu_kernel,
            out_shape=jax.ShapeDtypeStruct((rows, _LANES), orig_dtype),
            grid_spec=pltpu.PrefetchScalarGridSpec(
                num_scalar_prefetch=0,
                grid=grid,
                in_specs=[pl.BlockSpec((br, _LANES), lambda i: (i, 0))],
                out_specs=pl.BlockSpec((br, _LANES), lambda i: (i, 0)),
            ),
            compiler_params=compiler_params,
            cost_estimate=cost,
            input_output_aliases=io_alias,
        )(x2d)
        return out2d.reshape(orig_shape)

    # Ragged path (n not lane-aligned; rare for ViT activations): run the
    # kernel directly on a (1, n) view with a lane-blocked BlockSpec.  No
    # jnp.pad and no output slice -> no extra full-array HBM copies; Pallas
    # masks the partial last block.
    x2d = x_flat.reshape(1, n)
    lb = min(_RAGGED_LANE_BLOCK, _round_up(n, _LANES))
    grid = (pl.cdiv(n, lb),)
    out2d = pl.pallas_call(
        _gelu_kernel,
        out_shape=jax.ShapeDtypeStruct((1, n), orig_dtype),
        grid_spec=pltpu.PrefetchScalarGridSpec(
            num_scalar_prefetch=0,
            grid=grid,
            in_specs=[pl.BlockSpec((1, lb), lambda i: (0, i))],
            out_specs=pl.BlockSpec((1, lb), lambda i: (0, i)),
        ),
        compiler_params=compiler_params,
        cost_estimate=cost,
        input_output_aliases=io_alias,
    )(x2d)
    return out2d.reshape(orig_shape)


def _gelu_reference(x):
    xf = x.astype(jnp.float32)
    y = 0.5 * xf * (1.0 + jnp.tanh(_SQRT_2_OVER_PI * (xf + _GELU_COEF * xf ** 3)))
    return y.astype(x.dtype)


if __name__ == "__main__":
    key = jax.random.PRNGKey(0)

    # NCHW input, matching the PyTorch module's typical usage.
    x = jax.random.normal(key, (2, 4, 16, 16), dtype=jnp.float32)
    y = gelu_pallas(x)
    jax.block_until_ready(y)
    y_ref = _gelu_reference(x)
    assert y.shape == x.shape and y.dtype == x.dtype
    assert jnp.allclose(y, y_ref, atol=1e-5, rtol=1e-5), "f32 mismatch vs reference"

    # Ragged (non-lane-aligned) shape exercises the (1, n) lane-blocked path.
    x_odd = jax.random.normal(jax.random.PRNGKey(1), (3, 5, 7), dtype=jnp.float32)
    y_odd = gelu_pallas(x_odd)
    jax.block_until_ready(y_odd)
    assert y_odd.shape == x_odd.shape
    assert jnp.allclose(y_odd, _gelu_reference(x_odd), atol=1e-5, rtol=1e-5), \
        "ragged mismatch vs reference"

    # bf16 activations (typical for ViT): bf16 HBM I/O, f32 internal math.
    x_bf16 = jax.random.normal(jax.random.PRNGKey(2), (2, 4, 16, 16),
                               dtype=jnp.bfloat16)
    y_bf16 = gelu_pallas(x_bf16)
    jax.block_until_ready(y_bf16)
    assert y_bf16.dtype == jnp.bfloat16
    assert jnp.allclose(y_bf16.astype(jnp.float32),
                        _gelu_reference(x_bf16).astype(jnp.float32),
                        atol=2e-2, rtol=2e-2), "bf16 mismatch vs reference"

    print("KERNEL_OK")
</pallas_src>

<mosaic_0001>
module attributes {stable_mosaic.version = 11 : i64} {
  func.func @_gelu_kernel(%arg0: i32, %arg1: memref<16x128xf32, #tpu.memory_space<vmem>>, %arg2: memref<16x128xf32, #tpu.memory_space<vmem>>) attributes {dimension_semantics = [#tpu.dimension_semantics<parallel>], iteration_bounds = array<i64: 1>, scalar_prefetch = 0 : i64, scratch_operands = 0 : i64, tpu.core_type = #tpu.core_type<tc>, window_params = [{transform_indices = @transform_0, window_bounds = array<i64: 16, 128>}, {transform_indices = @transform_1, window_bounds = array<i64: 16, 128>}]} {
    %c0 = arith.constant 0 : index
    %c0_0 = arith.constant 0 : index
    %0 = vector.load %arg1[%c0, %c0_0] : memref<16x128xf32, #tpu.memory_space<vmem>>, vector<16x128xf32>
    %cst = arith.constant 4.471500e-02 : f32
    %1 = vector.broadcast %cst : f32 to vector<16x128xf32>
    %2 = arith.mulf %1, %0 : vector<16x128xf32>
    %3 = arith.mulf %2, %0 : vector<16x128xf32>
    %4 = arith.mulf %3, %0 : vector<16x128xf32>
    %5 = arith.addf %0, %4 : vector<16x128xf32>
    %cst_1 = arith.constant 0.797884583 : f32
    %6 = vector.broadcast %cst_1 : f32 to vector<16x128xf32>
    %7 = arith.mulf %6, %5 : vector<16x128xf32>
    %cst_2 = arith.constant 5.000000e-01 : f32
    %8 = vector.broadcast %cst_2 : f32 to vector<16x128xf32>
    %9 = arith.mulf %8, %0 : vector<16x128xf32>
    %10 = math.tanh %7 : vector<16x128xf32>
    %cst_3 = arith.constant 1.000000e+00 : f32
    %11 = vector.broadcast %cst_3 : f32 to vector<16x128xf32>
    %12 = arith.addf %11, %10 : vector<16x128xf32>
    %13 = arith.mulf %9, %12 : vector<16x128xf32>
    %c0_4 = arith.constant 0 : index
    %c0_5 = arith.constant 0 : index
    %14 = vector.load %arg2[%c0_4, %c0_5] : memref<16x128xf32, #tpu.memory_space<vmem>>, vector<16x128xf32>
    tpu.vector_store %arg2[%c0_4, %c0_5], %13 {strides = array<i32>} : memref<16x128xf32, #tpu.memory_space<vmem>>, vector<16x128xf32>,
    return
  }
  func.func @transform_0(%arg0: i32) -> (i32, i32) {
    %c0_i32 = arith.constant 0 : i32
    %c0_i32_0 = arith.constant 0 : i32
    return %arg0, %c0_i32 : i32, i32
  }
  func.func @transform_1(%arg0: i32) -> (i32, i32) {
    %c0_i32 = arith.constant 0 : i32
    %c0_i32_0 = arith.constant 0 : i32
    return %arg0, %c0_i32 : i32, i32
  }
}

</mosaic_0001>

<bundles_post_ra>
// kernel: gelu_pallas.1
= control target key start
LH: loop header
LB: loop body
LE: loop exit
PB: predicated region body
PF: predicated region fallthrough
CT: control target
= control target key end

     0   :  { %s60_s0 = inlined_call_operand.vmem [shape: f32[16,128], index: 0, kind: input, shape index: {}]   ;;  %s61_s1 = inlined_call_operand.vmem [shape: f32[16,128], index: 1, kind: output, shape index: {}]  }
   0x1   :  { %v8_v0 = vld [vmem:[%s60_s0] sm:$0xff]  ;;  %v9_v1 = vld [vmem:[%s60_s0 + $0x8] sm:$0xff] }
   0x2   :  { %v10_v2 = vmul.f32 0.044715, %v8_v0  ;;  %v11_v3 = vmul.f32 0.044715, %v9_v1  ;;  %v20_v12 = vmul.f32 0.5, %v8_v0  ;;  %v21_v14 = vmul.f32 0.5, %v9_v1 }
   0x4   :  { %v12_v4 = vmul.f32 %v10_v2, %v8_v0  ;;  %v13_v5 = vmul.f32 %v11_v3, %v9_v1 }
   0x6   :  { %v14_v6 = vmul.f32 %v12_v4, %v8_v0  ;;  %v15_v7 = vmul.f32 %v13_v5, %v9_v1 }
   0x8   :  { %v16_v8 = vadd.f32 %v14_v6, %v8_v0  ;;  %v17_v9 = vadd.f32 %v15_v7, %v9_v1 }
   0xa   :  { %v18_v10 = vmul.f32 0.7978846, %v16_v8  ;;  %v19_v11 = vmul.f32 0.7978846, %v17_v9 }
   0xc   :  { %34 = vtanh.f32 %v18_v10 }
   0xd   :  { %36 = vtanh.f32 %v19_v11 }
  0x16   :  { %v35_v13 = vpop.eup %34 }
  0x17   :  { %v37_v15 = vpop.eup %36  ;;  %v24_v16 = vadd.f32 1.0, %v35_v13 }
  0x18   :  { %v25_v17 = vadd.f32 1.0, %v37_v15 }
  0x19   :  { %v26_v18 = vmul.f32 %v24_v16, %v20_v12 }
  0x1a   :  { %v27_v19 = vmul.f32 %v25_v17, %v21_v14 }
  0x1b   :  { %28 = vst [vmem:[%s61_s1] sm:$0xff] %v26_v18 }
  0x1c   :  { %29 = vst [vmem:[%s61_s1 + $0x8] sm:$0xff] %v27_v19 }

</bundles_post_ra>
